<compile_context>
chip_gen: v5e
topology: v5e:2x2
jax: 0.10.0
libtpu: 0.0.40
codegen_flags: <defaults>
</compile_context>

<pallas_src>
import jax
import jax.numpy as jnp
from jax.experimental import pallas as pl
from jax.experimental.pallas import tpu as pltpu

LANE = 128        # lane width: hidden/output feature dims padded to this
SUBLANE_BF16 = 16 # bf16 sublane packing for batch-tile rounding
MAX_TILE_B = 2048 # upper bound on batch tile (VMEM use stays ~2-3 MiB)


def _round_up(x, m):
    return ((x + m - 1) // m) * m


def _cdiv(a, b):
    return (a + b - 1) // b


# ----------------------------------------------------------------------------
# Kernel
# ----------------------------------------------------------------------------
def mlp_kernel(x_ref, w1_ref, b1_ref, w2_ref, b2_ref, w3_ref, b3_ref, o_ref):
    # x streams in unpadded f32; cast to bf16 in-register for the MXU.
    x = x_ref[...].astype(w1_ref.dtype)
    # Layer 1: bf16 MXU matmul (K = obs_size, unpadded), f32 accumulation.
    h1 = jnp.dot(x, w1_ref[...], preferred_element_type=jnp.float32)
    h1 = jnp.maximum(h1 + b1_ref[...], 0.0)          # f32 bias + ReLU on VPU
    # Layer 2.
    h2 = jnp.dot(h1.astype(w2_ref.dtype), w2_ref[...],
                 preferred_element_type=jnp.float32)
    h2 = jnp.maximum(h2 + b2_ref[...], 0.0)
    # Layer 3 (no activation), lane-dense store.
    out = jnp.dot(h2.astype(w3_ref.dtype), w3_ref[...],
                  preferred_element_type=jnp.float32)
    o_ref[...] = (out + b3_ref[...]).astype(o_ref.dtype)


# ----------------------------------------------------------------------------
# One-time parameter preparation (hoisted out of the hot forward path)
# ----------------------------------------------------------------------------
def prepare_params(params):
    """Pad + cast weights/biases once. Weights -> bf16, biases -> f32.

    w1 keeps its K dim == obs_size (matches the unpadded x stream); all
    hidden/output feature dims are zero-padded to multiples of 128 lanes.
    """
    w1, b1, w2, b2, w3, b3 = (params[k] for k in ("w1", "b1", "w2", "b2", "w3", "b3"))
    obs_size, hidden = w1.shape
    n_act = w3.shape[1]
    H_P = _round_up(hidden, LANE)
    NA_P = _round_up(n_act, LANE)

    def pad2(a, r, c, dtype):
        out = jnp.zeros((r, c), dtype)
        return out.at[: a.shape[0], : a.shape[1]].set(a.astype(dtype))

    return {
        "w1": pad2(w1, obs_size, H_P, jnp.bfloat16),
        "b1": pad2(b1, 1, H_P, jnp.float32),
        "w2": pad2(w2, H_P, H_P, jnp.bfloat16),
        "b2": pad2(b2, 1, H_P, jnp.float32),
        "w3": pad2(w3, H_P, NA_P, jnp.bfloat16),
        "b3": pad2(b3, 1, NA_P, jnp.float32),
    }


# ----------------------------------------------------------------------------
# Batch-tile selection
# ----------------------------------------------------------------------------
def _choose_tile_b(B):
    if B <= 256:
        # Latency path: one grid step, tile == full batch, zero padding/masking.
        return B
    # Throughput path: >= 2 grid steps (v7x: both TensorCores), even step
    # count when possible, tile a multiple of 16 (bf16 sublane packing),
    # capped so per-tile VMEM stays small on every generation (incl. v7x).
    nb = max(2, _cdiv(B, MAX_TILE_B))
    if nb % 2:
        nb += 1
    return min(MAX_TILE_B, _round_up(_cdiv(B, nb), SUBLANE_BF16))


# ----------------------------------------------------------------------------
# Forward
# ----------------------------------------------------------------------------
def mlp_forward(x, prepared, n_act):
    """x: [B, obs_size] float32 (unpadded). prepared: output of prepare_params."""
    w1p, b1p = prepared["w1"], prepared["b1"]
    w2p, b2p = prepared["w2"], prepared["b2"]
    w3p, b3p = prepared["w3"], prepared["b3"]

    B, obs_size = x.shape
    assert w1p.shape[0] == obs_size
    H_P = w1p.shape[1]
    NA_P = w3p.shape[1]

    TILE_B = _choose_tile_b(B)
    nb = _cdiv(B, TILE_B)  # ragged tail (if any) handled by Pallas masking

    # Advisory cost: work the kernel actually performs / bytes it streams.
    flops = 2 * B * (obs_size * H_P + H_P * H_P + H_P * NA_P)
    bytes_accessed = (
        B * obs_size * 4                              # streamed x (f32, unpadded)
        + (w1p.size + w2p.size + w3p.size) * 2        # resident weights (bf16)
        + (b1p.size + b2p.size + b3p.size) * 4        # biases (f32)
        + B * NA_P * 4                                # streamed out (f32)
    )

    def resident(shape):
        # Same block every grid step -> weights/biases stay resident in VMEM.
        return pl.BlockSpec(shape, lambda i: (0, 0))

    out_p = pl.pallas_call(
        mlp_kernel,
        out_shape=jax.ShapeDtypeStruct((B, NA_P), jnp.float32),
        grid=(nb,),
        in_specs=[
            pl.BlockSpec((TILE_B, obs_size), lambda i: (i, 0)),  # x: batch-tiled, unpadded
            resident((obs_size, H_P)),
            resident((1, H_P)),
            resident((H_P, H_P)),
            resident((1, H_P)),
            resident((H_P, NA_P)),
            resident((1, NA_P)),
        ],
        out_specs=pl.BlockSpec((TILE_B, NA_P), lambda i: (i, 0)),
        compiler_params=pltpu.CompilerParams(
            dimension_semantics=("parallel",),       # shard batch across TCs on v7x
            vmem_limit_bytes=32 * 1024 * 1024,
        ),
        cost_estimate=pl.CostEstimate(
            flops=flops, bytes_accessed=bytes_accessed, transcendentals=0
        ),
    )(x, w1p, b1p, w2p, b2p, w3p, b3p)

    # Real Q-values. If the consumer can read the padded slab directly (or the
    # slice fuses under jit), this extra HBM pass disappears.
    return out_p[:, :n_act]


# ----------------------------------------------------------------------------
# Init + references
# ----------------------------------------------------------------------------
def init_params(key, obs_size, n_act, hidden=50):
    # PyTorch default Linear init: U(-1/sqrt(fan_in), +1/sqrt(fan_in)).
    ks = jax.random.split(key, 6)

    def uniform(k, shape, fan_in):
        bound = 1.0 / jnp.sqrt(float(fan_in))
        return jax.random.uniform(k, shape, jnp.float32, -bound, bound)

    return {
        "w1": uniform(ks[0], (obs_size, hidden), obs_size),
        "b1": uniform(ks[1], (1, hidden), obs_size),
        "w2": uniform(ks[2], (hidden, hidden), hidden),
        "b2": uniform(ks[3], (1, hidden), hidden),
        "w3": uniform(ks[4], (hidden, n_act), hidden),
        "b3": uniform(ks[5], (1, n_act), hidden),
    }


def mlp_reference_f32(x, p):
    h1 = jnp.maximum(x @ p["w1"] + p["b1"], 0.0)
    h2 = jnp.maximum(h1 @ p["w2"] + p["b2"], 0.0)
    return h2 @ p["w3"] + p["b3"]


def mlp_reference_bf16(x, p):
    # Same quantization as the kernel path: bf16 matmul inputs, f32 accumulate.
    bf16, f32 = jnp.bfloat16, jnp.float32
    h1 = jnp.maximum(
        jnp.dot(x.astype(bf16), p["w1"].astype(bf16), preferred_element_type=f32)
        + p["b1"], 0.0)
    h2 = jnp.maximum(
        jnp.dot(h1.astype(bf16), p["w2"].astype(bf16), preferred_element_type=f32)
        + p["b2"], 0.0)
    return jnp.dot(h2.astype(bf16), p["w3"].astype(bf16),
                   preferred_element_type=f32) + p["b3"]


if __name__ == "__main__":
    # NOTE: at B=2 this is pure launch/DMA overhead; real wins come from
    # batching many env steps into one call (the kernel scales to large B).
    obs_size, n_act, batch = 16, 4, 2
    key = jax.random.PRNGKey(0)
    kx, kp = jax.random.split(key)
    x = jax.random.normal(kx, (batch, obs_size), jnp.float32)
    params = init_params(kp, obs_size, n_act)

    # Pad + cast params once (outside the hot path / jitted step).
    prepared = prepare_params(params)

    out = mlp_forward(x, prepared, n_act)
    out = jax.block_until_ready(out)

    assert out.shape == (batch, n_act)
    # Tight check vs. a bf16-matched reference (same quantization path).
    ref_bf16 = mlp_reference_bf16(x, params)
    assert jnp.allclose(out, ref_bf16, atol=1e-4, rtol=1e-4)
    # Loose check vs. the full-f32 reference (bf16 MXU inputs).
    ref_f32 = mlp_reference_f32(x, params)
    assert jnp.allclose(out, ref_f32, atol=5e-2, rtol=5e-2)
    print("KERNEL_OK")
</pallas_src>

<mosaic_0001>
module attributes {stable_mosaic.version = 11 : i64} {
  func.func @mlp_kernel(%arg0: i32, %arg1: memref<2x16xf32, #tpu.memory_space<vmem>>, %arg2: memref<16x128xbf16, #tpu.memory_space<vmem>>, %arg3: memref<1x128xf32, #tpu.memory_space<vmem>>, %arg4: memref<128x128xbf16, #tpu.memory_space<vmem>>, %arg5: memref<1x128xf32, #tpu.memory_space<vmem>>, %arg6: memref<128x128xbf16, #tpu.memory_space<vmem>>, %arg7: memref<1x128xf32, #tpu.memory_space<vmem>>, %arg8: memref<2x128xf32, #tpu.memory_space<vmem>>) attributes {dimension_semantics = [#tpu.dimension_semantics<parallel>], iteration_bounds = array<i64: 1>, scalar_prefetch = 0 : i64, scratch_operands = 0 : i64, tpu.core_type = #tpu.core_type<tc>, window_params = [{transform_indices = @transform_0, window_bounds = array<i64: 2, 16>}, {pipeline_mode = #tpu.pipeline_mode<synchronous>, transform_indices = @transform_1, window_bounds = array<i64: 16, 128>}, {pipeline_mode = #tpu.pipeline_mode<synchronous>, transform_indices = @transform_2, window_bounds = array<i64: 1, 128>}, {pipeline_mode = #tpu.pipeline_mode<synchronous>, transform_indices = @transform_3, window_bounds = array<i64: 128, 128>}, {pipeline_mode = #tpu.pipeline_mode<synchronous>, transform_indices = @transform_4, window_bounds = array<i64: 1, 128>}, {pipeline_mode = #tpu.pipeline_mode<synchronous>, transform_indices = @transform_5, window_bounds = array<i64: 128, 128>}, {pipeline_mode = #tpu.pipeline_mode<synchronous>, transform_indices = @transform_6, window_bounds = array<i64: 1, 128>}, {transform_indices = @transform_7, window_bounds = array<i64: 2, 128>}]} {
    %c0 = arith.constant 0 : index
    %c0_0 = arith.constant 0 : index
    %0 = vector.load %arg1[%c0, %c0_0] : memref<2x16xf32, #tpu.memory_space<vmem>>, vector<2x16xf32>
    %1 = arith.truncf %0 : vector<2x16xf32> to vector<2x16xbf16>
    %c0_1 = arith.constant 0 : index
    %c0_2 = arith.constant 0 : index
    %2 = vector.load %arg2[%c0_1, %c0_2] : memref<16x128xbf16, #tpu.memory_space<vmem>>, vector<16x128xbf16>
    %cst = arith.constant dense<0.000000e+00> : vector<2x128xf32>
    %3 = tpu.matmul %1, %2, %cst {dimension_numbers = #tpu.dot_dimension_numbers<[1], [0], [0], [1], [0, 0, 1, 1], [], []>} : vector<2x16xbf16>, vector<16x128xbf16>, vector<2x128xf32> -> vector<2x128xf32>
    %c0_3 = arith.constant 0 : index
    %c0_4 = arith.constant 0 : index
    %4 = vector.load %arg3[%c0_3, %c0_4] : memref<1x128xf32, #tpu.memory_space<vmem>>, vector<1x128xf32>
    %5 = vector.broadcast %4 : vector<1x128xf32> to vector<2x128xf32>
    %6 = arith.addf %3, %5 : vector<2x128xf32>
    %cst_5 = arith.constant 0.000000e+00 : f32
    %7 = vector.broadcast %cst_5 : f32 to vector<2x128xf32>
    %8 = arith.maximumf %6, %7 : vector<2x128xf32>
    %9 = arith.truncf %8 : vector<2x128xf32> to vector<2x128xbf16>
    %c0_6 = arith.constant 0 : index
    %c0_7 = arith.constant 0 : index
    %10 = vector.load %arg4[%c0_6, %c0_7] : memref<128x128xbf16, #tpu.memory_space<vmem>>, vector<128x128xbf16>
    %cst_8 = arith.constant dense<0.000000e+00> : vector<2x128xf32>
    %11 = tpu.matmul %9, %10, %cst_8 {dimension_numbers = #tpu.dot_dimension_numbers<[1], [0], [0], [1], [0, 0, 1, 1], [], []>} : vector<2x128xbf16>, vector<128x128xbf16>, vector<2x128xf32> -> vector<2x128xf32>
    %c0_9 = arith.constant 0 : index
    %c0_10 = arith.constant 0 : index
    %12 = vector.load %arg5[%c0_9, %c0_10] : memref<1x128xf32, #tpu.memory_space<vmem>>, vector<1x128xf32>
    %13 = vector.broadcast %12 : vector<1x128xf32> to vector<2x128xf32>
    %14 = arith.addf %11, %13 : vector<2x128xf32>
    %cst_11 = arith.constant 0.000000e+00 : f32
    %15 = vector.broadcast %cst_11 : f32 to vector<2x128xf32>
    %16 = arith.maximumf %14, %15 : vector<2x128xf32>
    %17 = arith.truncf %16 : vector<2x128xf32> to vector<2x128xbf16>
    %c0_12 = arith.constant 0 : index
    %c0_13 = arith.constant 0 : index
    %18 = vector.load %arg6[%c0_12, %c0_13] : memref<128x128xbf16, #tpu.memory_space<vmem>>, vector<128x128xbf16>
    %cst_14 = arith.constant dense<0.000000e+00> : vector<2x128xf32>
    %19 = tpu.matmul %17, %18, %cst_14 {dimension_numbers = #tpu.dot_dimension_numbers<[1], [0], [0], [1], [0, 0, 1, 1], [], []>} : vector<2x128xbf16>, vector<128x128xbf16>, vector<2x128xf32> -> vector<2x128xf32>
    %c0_15 = arith.constant 0 : index
    %c0_16 = arith.constant 0 : index
    %20 = vector.load %arg7[%c0_15, %c0_16] : memref<1x128xf32, #tpu.memory_space<vmem>>, vector<1x128xf32>
    %21 = vector.broadcast %20 : vector<1x128xf32> to vector<2x128xf32>
    %22 = arith.addf %19, %21 : vector<2x128xf32>
    %c0_17 = arith.constant 0 : index
    %c0_18 = arith.constant 0 : index
    %23 = vector.load %arg8[%c0_17, %c0_18] : memref<2x128xf32, #tpu.memory_space<vmem>>, vector<2x128xf32>
    tpu.vector_store %arg8[%c0_17, %c0_18], %22 {strides = array<i32>} : memref<2x128xf32, #tpu.memory_space<vmem>>, vector<2x128xf32>,
    return
  }
  func.func @transform_0(%arg0: i32) -> (i32, i32) {
    %c0_i32 = arith.constant 0 : i32
    %c0_i32_0 = arith.constant 0 : i32
    return %arg0, %c0_i32 : i32, i32
  }
  func.func @transform_1(%arg0: i32) -> (i32, i32) {
    %c0_i32 = arith.constant 0 : i32
    %c0_i32_0 = arith.constant 0 : i32
    %c0_i32_1 = arith.constant 0 : i32
    return %c0_i32, %c0_i32_0 : i32, i32
  }
  func.func @transform_2(%arg0: i32) -> (i32, i32) {
    %c0_i32 = arith.constant 0 : i32
    %c0_i32_0 = arith.constant 0 : i32
    %c0_i32_1 = arith.constant 0 : i32
    return %c0_i32, %c0_i32_0 : i32, i32
  }
  func.func @transform_3(%arg0: i32) -> (i32, i32) {
    %c0_i32 = arith.constant 0 : i32
    %c0_i32_0 = arith.constant 0 : i32
    %c0_i32_1 = arith.constant 0 : i32
    return %c0_i32, %c0_i32_0 : i32, i32
  }
  func.func @transform_4(%arg0: i32) -> (i32, i32) {
    %c0_i32 = arith.constant 0 : i32
    %c0_i32_0 = arith.constant 0 : i32
    %c0_i32_1 = arith.constant 0 : i32
    return %c0_i32, %c0_i32_0 : i32, i32
  }
  func.func @transform_5(%arg0: i32) -> (i32, i32) {
    %c0_i32 = arith.constant 0 : i32
    %c0_i32_0 = arith.constant 0 : i32
    %c0_i32_1 = arith.constant 0 : i32
    return %c0_i32, %c0_i32_0 : i32, i32
  }
  func.func @transform_6(%arg0: i32) -> (i32, i32) {
    %c0_i32 = arith.constant 0 : i32
    %c0_i32_0 = arith.constant 0 : i32
    %c0_i32_1 = arith.constant 0 : i32
    return %c0_i32, %c0_i32_0 : i32, i32
  }
  func.func @transform_7(%arg0: i32) -> (i32, i32) {
    %c0_i32 = arith.constant 0 : i32
    %c0_i32_0 = arith.constant 0 : i32
    return %arg0, %c0_i32 : i32, i32
  }
}

</mosaic_0001>

<bundles_post_ra>
// kernel: tpu_custom_call.1
= control target key start
LH: loop header
LB: loop body
LE: loop exit
PB: predicated region body
PF: predicated region fallthrough
CT: control target
= control target key end

     0   :  { %12 = vsyncpa [#allocation3], 0  ;;  %s601_s0 = inlined_call_operand.hbm [shape: f32[2,16], index: 0, kind: input, shape index: {}]   ;;  %s602_s1 = inlined_call_operand.hbm [shape: bf16[16,128], index: 1, kind: input, shape index: {}]   ;;  %s603_s2 = inlined_call_operand.vmem [shape: f32[1,128], index: 2, kind: input, shape index: {}]   ;;  %s604_s3 = inlined_call_operand.hbm [shape: bf16[128,128], index: 3, kind: input, shape index: {}]   ;;  %s605_s4 = inlined_call_operand.vmem [shape: f32[1,128], index: 4, kind: input, shape index: {}]   ;;  %s606_s5 = inlined_call_operand.hbm [shape: bf16[128,128], index: 5, kind: input, shape index: {}]   ;;  %s607_s6 = inlined_call_operand.vmem [shape: f32[1,128], index: 6, kind: input, shape index: {}]   ;;  %s608_s7 = inlined_call_operand.hbm [shape: f32[2,128], index: 7, kind: output, shape index: {}]  }
   0x1   :  { %13 = vsyncpa [#allocation6], 0 }
   0x2   :  { %14 = vsyncpa [#allocation9], 0  ;;  %s31_s26 = sshll.u32 %s602_s1, 4  ;;  %s32_s26 = int_to_ptr.hbm [resolvable:$true] %s31_s26 }
   0x3   :  { %15 = vsyncpa [#allocation4], 0  ;;  %s530_s27 = smov [#allocation5]   ;;  %s21_s8 = sshll.u32 %s601_s0, 4  ;;  %s22_s8 = int_to_ptr.hbm [resolvable:$true] %s21_s8 }
   0x4   :  { %s33_s28 = sshll.u32 %s530_s27, 4  ;;  %s531_s9 = smov 64   ;;  %s34_s28 = int_to_ptr.vmem [resolvable:$true] %s33_s28 }
   0x5   :  { %s532_s10 = smov 4   ;;  %s533_s11 = smov [#allocation2]  }
   0x6   :  { %39 = dma.hbm_to_vmem [thread:$0]  %s32_s26, 128, %s34_s28, [#allocation6], %s531_s9, %s531_s9, %s532_s10  }
   0x7   :  { %s23_s12 = sshll.u32 %s533_s11, 4  ;;  %s46_s15 = sshll.u32 %s604_s3, 4  ;;  %s24_s12 = int_to_ptr.vmem [resolvable:$true] %s23_s12  ;;  %s47_s15 = int_to_ptr.hbm [resolvable:$true] %s46_s15 }
   0x8   :  { %26 = dma.hbm_to_vmem [thread:$0]  %s22_s8, 32, %s24_s12, [#allocation3]  }
   0x9   :  { %s61_s17 = sshll.u32 %s606_s5, 4  ;;  %s534_s18 = smov [#allocation7]   ;;  %s62_s17 = int_to_ptr.hbm [resolvable:$true] %s61_s17 }
   0xa   :  { %s48_s19 = sshll.u32 %s534_s18, 4  ;;  %s535_s0 = smov [#allocation8]   ;;  %s49_s19 = int_to_ptr.vmem [resolvable:$true] %s48_s19 }
   0xb   :  { %54 = dma.hbm_to_vmem [thread:$0]  %s47_s15, 1024, %s49_s19, [#allocation6], %s531_s9, %s531_s9, %s532_s10  }
   0xc   :  { %s63_s20 = sshll.u32 %s535_s0, 4  ;;  %s64_s20 = int_to_ptr.vmem [resolvable:$true] %s63_s20 }
   0xd   :  { %69 = dma.hbm_to_vmem [thread:$0]  %s62_s17, 1024, %s64_s20, [#allocation9], %s531_s9, %s531_s9, %s532_s10  }
   0xe   :  { %522 = dma.done.wait [#allocation3], 32  }
   0xf   :  { %523 = vsyncadd [#allocation3], 4294967264 }
  0x10   :  { %524 = dma.done.wait [#allocation6], 1152  }
  0x11   :  { %525 = vsyncadd [#allocation6], 4294966144 }
  0x12   :  { %526 = dma.done.wait [#allocation9], 1024  }
  0x13   :  { %527 = vsyncadd [#allocation9], 4294966272  ;;  %v375_v0 = vld [vmem:[#allocation5] sm:$0xff]  ;;  %v89_v1 = vld [vmem:[#allocation2] sm:$0x3]  ;;  %vm103_vm0 = vcmask 130048  }
  0x14   :  { %v383_v2 = vld [vmem:[#allocation7 + $0x38] sm:$0xff]  ;;  %v90_v3 = vpack.c.bf16 %v89_v1, %v89_v1  ;;  %114 = vmatpush.bf16.msra.mxu0 %v375_v0  ;;  %v382_v4 = vld [vmem:[#allocation7 + $0x30] sm:$0xff]  ;;  %v381_v5 = vld [vmem:[#allocation7 + $0x28] sm:$0xff]  ;;  %s536_s24 = smov [#allocation10]   ;;  %s294_s28 = sshll.u32 %s608_s7, 4  ;;  %s295_s28 = int_to_ptr.hbm [resolvable:$true] %s294_s28 }
  0x15   :  { %190 = vmatpush.bf16.msra.mxu1 %v383_v2  ;;  %v380_v6 = vld [vmem:[#allocation7 + $0x20] sm:$0xff]  ;;  %v379_v7 = vld [vmem:[#allocation7 + $0x18] sm:$0xff]  ;;  %v378_v8 = vld [vmem:[#allocation7 + $0x10] sm:$0xff]  ;;  %s292_s25 = sshll.u32 %s536_s24, 4  ;;  %s293_s25 = int_to_ptr.vmem [resolvable:$true] %s292_s25 }
  0x16   :  { %v377_v9 = vld [vmem:[#allocation7 + $0x8] sm:$0xff]  ;;  %v376_v10 = vld [vmem:[#allocation7] sm:$0xff]  ;;  %v391_v11 = vld [vmem:[#allocation8 + $0x38] sm:$0xff] }
  0x17   :  { %310 = vmatmul.msk.bf16.vlgmr.msra.gmra.mxu0 %vm103_vm0, %v90_v3  ;;  %273 = vmatpush.bf16.msra.mxu2 %v391_v11  ;;  %v390_v12 = vld [vmem:[#allocation8 + $0x30] sm:$0xff]  ;;  %v389_v13 = vld [vmem:[#allocation8 + $0x28] sm:$0xff]  ;;  %v388_v14 = vld [vmem:[#allocation8 + $0x20] sm:$0xff] }
  0x18   :  { %v387_v15 = vld [vmem:[#allocation8 + $0x18] sm:$0xff]  ;;  %v386_v16 = vld [vmem:[#allocation8 + $0x10] sm:$0xff]  ;;  %v385_v23 = vld [vmem:[#allocation8 + $0x8] sm:$0xff] }
  0x19   :  { %191 = vmatpush.bf16.msra.mxu1 %v382_v4  ;;  %v399_v17 = vld [vmem:[%s603_s2] ss:$0 sm:$0xff]  ;;  %v384_v24 = vld [vmem:[#allocation8] sm:$0xff] }
  0x1a   :  { %v400_v25 = vld [vmem:[%s605_s4] ss:$0 sm:$0xff] }
  0x1b   :  { %274 = vmatpush.bf16.msra.mxu2 %v390_v12  ;;  %v401_v31 = vld [vmem:[%s607_s6] ss:$0 sm:$0xff] }
  0x1d   :  { %192 = vmatpush.bf16.msra.mxu1 %v381_v5 }
  0x1f   :  { %275 = vmatpush.bf16.msra.mxu2 %v389_v13 }
  0x21   :  { %193 = vmatpush.bf16.msra.mxu1 %v380_v6 }
  0x23   :  { %276 = vmatpush.bf16.msra.mxu2 %v388_v14 }
  0x25   :  { %194 = vmatpush.bf16.msra.mxu1 %v379_v7 }
  0x27   :  { %277 = vmatpush.bf16.msra.mxu2 %v387_v15 }
  0x29   :  { %195 = vmatpush.bf16.msra.mxu1 %v378_v8 }
  0x2b   :  { %278 = vmatpush.bf16.msra.mxu2 %v386_v16 }
  0x2d   :  { %196 = vmatpush.bf16.msra.mxu1 %v377_v9 }
  0x2f   :  { %279 = vmatpush.bf16.msra.mxu2 %v385_v23 }
  0x31   :  { %197 = vmatpush.bf16.msra.mxu1 %v376_v10 }
  0x33   :  { %280 = vmatpush.bf16.msra.mxu2 %v384_v24 }
  0x94   :  { %v116_v18 = vpop.f32.mrf.mxu0 }
  0x95   :  { %v117_v19 = vadd.f32 %v399_v17, %v116_v18 }
  0x97   :  { %v120_v20 = vmax.f32 %v117_v19, 0.0 }
  0x99   :  { %v121_v21 = vpack.c.bf16 %v120_v20, %v120_v20 }
  0x9b   :  { %198 = vmatmul.bf16.vlgmr.msra.gmra.mxu1 %v121_v21 }
  0x9c   :  { %v118_v22 = vpop.f32.mrf.mxu0 }
 0x118   :  { %v199_v26 = vpop.f32.mrf.mxu1 }
 0x119   :  { %v200_v27 = vadd.f32 %v400_v25, %v199_v26 }
 0x11b   :  { %v203_v28 = vmax.f32 %v200_v27, 0.0 }
 0x11d   :  { %v204_v29 = vpack.c.bf16 %v203_v28, %v203_v28 }
 0x11f   :  { %281 = vmatmul.bf16.vlgmr.msra.gmra.mxu2 %v204_v29 }
 0x120   :  { %v201_v30 = vpop.f32.mrf.mxu1 }
 0x1a2   :  { %v282_v32 = vpop.f32.mrf.mxu2 }
 0x1a3   :  { %v283_v33 = vadd.f32 %v401_v31, %v282_v32 }
 0x1a5   :  { %286 = vst [vmem:[#allocation10] sm:$0x3] %v283_v33 }
 0x1a6   :  { %297 = dma.vmem_to_hbm [thread:$0]  %s293_s25, 32, %s295_s28, [#allocation4]  }
 0x1aa   :  { %v284_v34 = vpop.f32.mrf.mxu2 }
 0x1ab   :  { %528 = dma.done.wait [#allocation4], 32  }
 0x1ac   :  { %529 = vsyncadd [#allocation4], 4294967264 }
 0x1ad   :  { %302 = vsyncpa [#allocation3], 1 }
 0x1ae   :  { %303 = vsyncpa [#allocation6], 1 }
 0x1af   :  { %304 = vsyncpa [#allocation9], 1 }
 0x1b0   :  { %305 = vsyncpa [#allocation4], 1 }

</bundles_post_ra>
